<compile_context>
chip_gen: v7x
topology: tpu7x:2x2x1
jax: 0.10.0
libtpu: 0.0.40
codegen_flags: <defaults>
</compile_context>

<pallas_src>
import jax
import jax.numpy as jnp
from jax import lax
from jax.experimental import pallas as pl
from jax.experimental.pallas import tpu as pltpu


def _round_up(x, m):
    return (x + m - 1) // m * m


def _mlp_l2norm_kernel(x_ref, w1_ref, b1_ref, w2_ref, b2_ref, out_ref):
    """Linear -> ReLU -> Linear -> L2-normalize on one (TM, Cp) row tile.

    x_ref  : VMEM (TM, Cp)   gathered patches (zero-padded rows/cols)
    w1_ref : VMEM (Cp, Dp),  b1_ref (1, Dp)
    w2_ref : VMEM (Dp, Dp),  b2_ref (1, Dp)
    out_ref: VMEM (TM, Dp)

    All padded weight rows/columns are zero, so padded output columns stay
    exactly 0 and the L2 norm over the padded lane width is unchanged.
    """
    g = x_ref[...]
    h = jnp.dot(g, w1_ref[...], preferred_element_type=jnp.float32) + b1_ref[...]
    h = jnp.maximum(h, 0.0).astype(w2_ref.dtype)
    y = jnp.dot(h, w2_ref[...], preferred_element_type=jnp.float32) + b2_ref[...]

    # F.normalize(p=2, dim=-1, eps=1e-12): y / max(||y||, eps).
    # rsqrt(max(sumsq, eps^2)) == 1/max(norm, eps) away from the zero vector.
    sumsq = jnp.sum(y * y, axis=-1, keepdims=True)
    inv = lax.rsqrt(jnp.maximum(sumsq, 1e-24))
    out_ref[...] = (y * inv).astype(out_ref.dtype)


def patch_sampler_layer(x_nchw, idx, w1, b1, w2, b2, *, max_rows_per_block=256):
    """Sample P patches per batch from (B, C, H, W), run MLP + L2 normalize.

    Returns (B, P, D) embeddings.
    """
    B, C, H, W = x_nchw.shape
    S = H * W
    P = idx.shape[1]
    D = w1.shape[1]

    # Gather only the sampled patches straight from the NCHW layout: the full
    # feature map is read exactly once and never transposed/re-written in HBM.
    x_bcs = x_nchw.reshape(B, C, S)
    g = jnp.take_along_axis(x_bcs, idx[:, None, :].astype(jnp.int32), axis=2)  # (B, C, P)
    g = jnp.transpose(g, (0, 2, 1)).reshape(B * P, C)                          # (B*P, C)

    M = B * P
    Cp = _round_up(C, 128)          # lane-dense matmul operands
    Dp = _round_up(D, 128)          # lane-dense output stores
    TM = _round_up(M, 8) if M <= max_rows_per_block else max_rows_per_block
    Mp = _round_up(M, TM)

    def pad2(a, r, c):
        if a.shape == (r, c):
            return a
        return jnp.pad(a, ((0, r - a.shape[0]), (0, c - a.shape[1])))

    g_p = pad2(g, Mp, Cp)
    w1_p = pad2(w1, Cp, Dp)
    b1_p = pad2(b1, 1, Dp)
    w2_p = pad2(w2, Dp, Dp)
    b2_p = pad2(b2, 1, Dp)

    out = pl.pallas_call(
        _mlp_l2norm_kernel,
        out_shape=jax.ShapeDtypeStruct((Mp, Dp), x_nchw.dtype),
        grid=(Mp // TM,),
        in_specs=[
            pl.BlockSpec((TM, Cp), lambda i: (i, 0)),   # row tile of gathered patches
            pl.BlockSpec((Cp, Dp), lambda i: (0, 0)),   # weights stay resident
            pl.BlockSpec((1, Dp), lambda i: (0, 0)),
            pl.BlockSpec((Dp, Dp), lambda i: (0, 0)),
            pl.BlockSpec((1, Dp), lambda i: (0, 0)),
        ],
        out_specs=pl.BlockSpec((TM, Dp), lambda i: (i, 0)),
        compiler_params=pltpu.CompilerParams(
            dimension_semantics=("parallel",)),         # independent row tiles (v7x 2-TC)
    )(g_p, w1_p, b1_p, w2_p, b2_p)

    return out[:M, :D].reshape(B, P, D)


def init_mlp_params(key, in_features, embedding_dim):
    """Deterministic nn.Linear-style init (uniform +/- 1/sqrt(fan_in))."""
    k1, k2, k3, k4 = jax.random.split(key, 4)
    lim1 = 1.0 / jnp.sqrt(in_features)
    lim2 = 1.0 / jnp.sqrt(embedding_dim)
    w1 = jax.random.uniform(k1, (in_features, embedding_dim), jnp.float32, -lim1, lim1)
    b1 = jax.random.uniform(k2, (1, embedding_dim), jnp.float32, -lim1, lim1)
    w2 = jax.random.uniform(k3, (embedding_dim, embedding_dim), jnp.float32, -lim2, lim2)
    b2 = jax.random.uniform(k4, (1, embedding_dim), jnp.float32, -lim2, lim2)
    return w1, b1, w2, b2


def patch_sampler_forward(layer_outs_nchw, patch_idx_per_layer, mlp_params):
    """Mirrors PatchSampler.forward with apply_mlp=True.

    layer_outs_nchw: list of (B, C, H, W) arrays.
    patch_idx_per_layer: list of (B, P) int32 index arrays.
    mlp_params: list of (w1, b1, w2, b2) per layer.
    Returns (sampled_patch_embeddings, sampled_patch_indices).
    """
    sampled_patches = []
    sampled_patches_idx = []
    for layer_out, idx, params in zip(layer_outs_nchw, patch_idx_per_layer, mlp_params):
        emb = patch_sampler_layer(layer_out, idx, *params)
        sampled_patches.append(emb)
        sampled_patches_idx.append(idx)
    return sampled_patches, sampled_patches_idx


def _reference_layer(x_nchw, idx, w1, b1, w2, b2):
    """Pure-JAX reference (follows the PyTorch module literally)."""
    B, C, H, W = x_nchw.shape
    x_bsc = jnp.transpose(x_nchw, (0, 2, 3, 1)).reshape(B, H * W, C)
    gathered = jnp.take_along_axis(x_bsc, idx[:, :, None], axis=1)  # (B, P, C)
    h = jnp.maximum(gathered @ w1 + b1, 0.0)
    y = h @ w2 + b2
    norm = jnp.sqrt(jnp.sum(y * y, axis=-1, keepdims=True))
    return y / jnp.maximum(norm, 1e-12)


if __name__ == "__main__":
    key = jax.random.PRNGKey(0)
    patch_embedding_dim = 32
    num_patches_per_layer = 8

    # Two "layer outputs" of differing channel/spatial size, like a CNN pyramid.
    k_x0, k_x1, k_idx, k_mlp0, k_mlp1 = jax.random.split(key, 5)
    layer_outs = [
        jax.random.normal(k_x0, (2, 4, 16, 16), jnp.float32),   # (B, C, H, W)
        jax.random.normal(k_x1, (2, 8, 8, 8), jnp.float32),
    ]

    # TODO(synk): torch.multinomial-style without-replacement sampling has no
    # clean Pallas equivalent; patch indices are sampled with jax.random glue.
    patch_idx_per_layer = []
    idx_keys = jax.random.split(k_idx, len(layer_outs))
    for lk, lo in zip(idx_keys, layer_outs):
        B, C, H, W = lo.shape
        S = H * W
        P = min(S, num_patches_per_layer)
        bkeys = jax.random.split(lk, B)
        idx = jnp.stack(
            [jax.random.choice(bk, S, shape=(P,), replace=False) for bk in bkeys]
        ).astype(jnp.int32)
        patch_idx_per_layer.append(idx)

    # Per-layer MLP params (Linear(C->D), ReLU, Linear(D->D)), deterministic init.
    mlp_params = [
        init_mlp_params(k_mlp0, layer_outs[0].shape[1], patch_embedding_dim),
        init_mlp_params(k_mlp1, layer_outs[1].shape[1], patch_embedding_dim),
    ]

    embeddings, indices = patch_sampler_forward(layer_outs, patch_idx_per_layer, mlp_params)
    embeddings = [jax.block_until_ready(e) for e in embeddings]

    # Verify against pure-JAX reference.
    for lo, idx, params, emb in zip(layer_outs, patch_idx_per_layer, mlp_params, embeddings):
        ref = _reference_layer(lo, idx, *params)
        assert emb.shape == ref.shape, (emb.shape, ref.shape)
        assert jnp.allclose(emb, ref, atol=1e-5, rtol=1e-5), float(jnp.max(jnp.abs(emb - ref)))

    print("KERNEL_OK")
</pallas_src>

<mosaic_0001>
module attributes {stable_mosaic.version = 11 : i64} {
  func.func @_mlp_l2norm_kernel(%arg0: i32, %arg1: memref<16x128xf32, #tpu.memory_space<vmem>>, %arg2: memref<128x128xf32, #tpu.memory_space<vmem>>, %arg3: memref<1x128xf32, #tpu.memory_space<vmem>>, %arg4: memref<128x128xf32, #tpu.memory_space<vmem>>, %arg5: memref<1x128xf32, #tpu.memory_space<vmem>>, %arg6: memref<16x128xf32, #tpu.memory_space<vmem>>) attributes {dimension_semantics = [#tpu.dimension_semantics<parallel>], iteration_bounds = array<i64: 1>, scalar_prefetch = 0 : i64, scratch_operands = 0 : i64, tpu.core_type = #tpu.core_type<tc>, window_params = [{transform_indices = @transform_0, window_bounds = array<i64: 16, 128>}, {pipeline_mode = #tpu.pipeline_mode<synchronous>, transform_indices = @transform_1, window_bounds = array<i64: 128, 128>}, {pipeline_mode = #tpu.pipeline_mode<synchronous>, transform_indices = @transform_2, window_bounds = array<i64: 1, 128>}, {pipeline_mode = #tpu.pipeline_mode<synchronous>, transform_indices = @transform_3, window_bounds = array<i64: 128, 128>}, {pipeline_mode = #tpu.pipeline_mode<synchronous>, transform_indices = @transform_4, window_bounds = array<i64: 1, 128>}, {transform_indices = @transform_5, window_bounds = array<i64: 16, 128>}]} {
    %c0 = arith.constant 0 : index
    %c0_0 = arith.constant 0 : index
    %0 = vector.load %arg1[%c0, %c0_0] : memref<16x128xf32, #tpu.memory_space<vmem>>, vector<16x128xf32>
    %c0_1 = arith.constant 0 : index
    %c0_2 = arith.constant 0 : index
    %1 = vector.load %arg2[%c0_1, %c0_2] : memref<128x128xf32, #tpu.memory_space<vmem>>, vector<128x128xf32>
    %cst = arith.constant dense<0.000000e+00> : vector<16x128xf32>
    %2 = tpu.matmul %0, %1, %cst {dimension_numbers = #tpu.dot_dimension_numbers<[1], [0], [0], [1], [0, 0, 1, 1], [], []>} : vector<16x128xf32>, vector<128x128xf32>, vector<16x128xf32> -> vector<16x128xf32>
    %c0_3 = arith.constant 0 : index
    %c0_4 = arith.constant 0 : index
    %3 = vector.load %arg3[%c0_3, %c0_4] : memref<1x128xf32, #tpu.memory_space<vmem>>, vector<1x128xf32>
    %4 = vector.broadcast %3 : vector<1x128xf32> to vector<16x128xf32>
    %5 = arith.addf %2, %4 : vector<16x128xf32>
    %cst_5 = arith.constant 0.000000e+00 : f32
    %6 = vector.broadcast %cst_5 : f32 to vector<16x128xf32>
    %7 = arith.maximumf %5, %6 : vector<16x128xf32>
    %c0_6 = arith.constant 0 : index
    %c0_7 = arith.constant 0 : index
    %8 = vector.load %arg4[%c0_6, %c0_7] : memref<128x128xf32, #tpu.memory_space<vmem>>, vector<128x128xf32>
    %cst_8 = arith.constant dense<0.000000e+00> : vector<16x128xf32>
    %9 = tpu.matmul %7, %8, %cst_8 {dimension_numbers = #tpu.dot_dimension_numbers<[1], [0], [0], [1], [0, 0, 1, 1], [], []>} : vector<16x128xf32>, vector<128x128xf32>, vector<16x128xf32> -> vector<16x128xf32>
    %c0_9 = arith.constant 0 : index
    %c0_10 = arith.constant 0 : index
    %10 = vector.load %arg5[%c0_9, %c0_10] : memref<1x128xf32, #tpu.memory_space<vmem>>, vector<1x128xf32>
    %11 = vector.broadcast %10 : vector<1x128xf32> to vector<16x128xf32>
    %12 = arith.addf %9, %11 : vector<16x128xf32>
    %13 = arith.mulf %12, %12 : vector<16x128xf32>
    %cst_11 = arith.constant dense<0.000000e+00> : vector<16xf32>
    %14 = vector.multi_reduction <add>, %13, %cst_11 [1] : vector<16x128xf32> to vector<16xf32>
    %15 = vector.shape_cast %14 : vector<16xf32> to vector<16x1xf32>
    %cst_12 = arith.constant 1.000000e-24 : f32
    %16 = vector.broadcast %cst_12 : f32 to vector<16x1xf32>
    %17 = arith.maximumf %15, %16 : vector<16x1xf32>
    %18 = math.rsqrt %17 : vector<16x1xf32>
    %19 = vector.broadcast %18 : vector<16x1xf32> to vector<16x128xf32>
    %20 = arith.mulf %12, %19 : vector<16x128xf32>
    %c0_13 = arith.constant 0 : index
    %c0_14 = arith.constant 0 : index
    %21 = vector.load %arg6[%c0_13, %c0_14] : memref<16x128xf32, #tpu.memory_space<vmem>>, vector<16x128xf32>
    tpu.vector_store %arg6[%c0_13, %c0_14], %20 {strides = array<i32>} : memref<16x128xf32, #tpu.memory_space<vmem>>, vector<16x128xf32>,
    return
  }
  func.func @transform_0(%arg0: i32) -> (i32, i32) {
    %c0_i32 = arith.constant 0 : i32
    %c0_i32_0 = arith.constant 0 : i32
    return %arg0, %c0_i32 : i32, i32
  }
  func.func @transform_1(%arg0: i32) -> (i32, i32) {
    %c0_i32 = arith.constant 0 : i32
    %c0_i32_0 = arith.constant 0 : i32
    %c0_i32_1 = arith.constant 0 : i32
    return %c0_i32, %c0_i32_0 : i32, i32
  }
  func.func @transform_2(%arg0: i32) -> (i32, i32) {
    %c0_i32 = arith.constant 0 : i32
    %c0_i32_0 = arith.constant 0 : i32
    %c0_i32_1 = arith.constant 0 : i32
    return %c0_i32, %c0_i32_0 : i32, i32
  }
  func.func @transform_3(%arg0: i32) -> (i32, i32) {
    %c0_i32 = arith.constant 0 : i32
    %c0_i32_0 = arith.constant 0 : i32
    %c0_i32_1 = arith.constant 0 : i32
    return %c0_i32, %c0_i32_0 : i32, i32
  }
  func.func @transform_4(%arg0: i32) -> (i32, i32) {
    %c0_i32 = arith.constant 0 : i32
    %c0_i32_0 = arith.constant 0 : i32
    %c0_i32_1 = arith.constant 0 : i32
    return %c0_i32, %c0_i32_0 : i32, i32
  }
  func.func @transform_5(%arg0: i32) -> (i32, i32) {
    %c0_i32 = arith.constant 0 : i32
    %c0_i32_0 = arith.constant 0 : i32
    return %arg0, %c0_i32 : i32, i32
  }
}

</mosaic_0001>

<bundles_post_ra>
// kernel: tpu_custom_call.1
= control target key start
LH: loop header
LB: loop body
LE: loop exit
PB: predicated region body
PF: predicated region fallthrough
CT: control target
= control target key end

     0   :  { %10 = vsyncpa [#allocation3], 0  ;;  %s679_s0 = inlined_call_operand.hbm [shape: f32[16,128], index: 0, kind: input, shape index: {}]   ;;  %s680_s1 = inlined_call_operand.hbm [shape: f32[128,128], index: 1, kind: input, shape index: {}]   ;;  %s681_s2 = inlined_call_operand.vmem [shape: f32[1,128], index: 2, kind: input, shape index: {}]   ;;  %s682_s3 = inlined_call_operand.hbm [shape: f32[128,128], index: 3, kind: input, shape index: {}]   ;;  %s683_s4 = inlined_call_operand.vmem [shape: f32[1,128], index: 4, kind: input, shape index: {}]   ;;  %s684_s5 = inlined_call_operand.hbm [shape: f32[16,128], index: 5, kind: output, shape index: {}]  }
   0x1   :  { %11 = vsyncpa [#allocation6], 0 }
   0x2   :  { %12 = vsyncpa [#allocation4], 0  ;;  %s570_s18 = smov [#allocation5]   ;;  %s571_s20 = smov [#allocation2]  }
   0x3   :  { %s30_s19 = sshll.u32 %s570_s18, 4  ;;  %s18_s21 = sshll.u32 %s571_s20, 4  ;;  %s31_s19 = int_to_ptr.vmem [resolvable:$true] %s30_s19  ;;  %s606_s21 = int_to_ptr.vmem [resolvable:$true] %s18_s21 }
   0x4   :  { %s476_s24 = scalar_lea.hbm %s680_s1, 2048 }
   0x5   :  { %p477_p0 = scmp.ne.s32.totalorder %s680_s1, %s476_s24  ;;  %p480_p1 = scmp.lt.u32.totalorder %s476_s24, %s680_s1 }
   0x7   :  { %p482_p2 = pnand %p480_p1, %p477_p0 }
   0x9   :  { %485 = shalt.err (!%p482_p2)
}
   0xa   :  { %s486_s29 = scalar_lea.vmem %s31_s19, 2048  ;;  %p491_p4 = scmp.lt.s32.totalorder %s31_s19, %s31_s19 }
   0xb   :  { %p487_p3 = scmp.ne.s32.totalorder %s31_s19, %s486_s29  ;;  %p492_p5 = scmp.lt.s32.totalorder %s486_s29, %s486_s29 }
   0xd   :  { %p493_p6 = por %p492_p5, %p491_p4 }
   0xf   :  { %p494_p7 = pnand %p493_p6, %p487_p3 }
  0x11   :  { %497 = shalt.err (!%p494_p7)
}
  0x12   :  { %s572_s30 = smov 128   ;;  %s573_s6 = smov 8  }
  0x13   :  { %36 = dma.hbm_to_vmem [thread:$0]  %s680_s1, 2048, %s31_s19, [#allocation6], %s572_s30, %s572_s30, %s573_s6  }
  0x14   :  { %s498_s11 = scalar_lea.hbm %s679_s0, 256 }
  0x15   :  { %p499_p8 = scmp.ne.s32.totalorder %s679_s0, %s498_s11  ;;  %p502_p9 = scmp.lt.u32.totalorder %s498_s11, %s679_s0 }
  0x17   :  { %p504_p10 = pnand %p502_p9, %p499_p8 }
  0x19   :  { %507 = shalt.err (!%p504_p10)
}
  0x1a   :  { %s508_s16 = scalar_lea.vmem %s606_s21, 256  ;;  %p513_p12 = scmp.lt.s32.totalorder %s606_s21, %s606_s21 }
  0x1b   :  { %p509_p11 = scmp.ne.s32.totalorder %s606_s21, %s508_s16  ;;  %p514_p13 = scmp.lt.s32.totalorder %s508_s16, %s508_s16 }
  0x1d   :  { %p515_p0 = por %p514_p13, %p513_p12 }
  0x1f   :  { %p516_p1 = pnand %p515_p0, %p509_p11 }
  0x21   :  { %519 = shalt.err (!%p516_p1)
}
  0x22   :  { %24 = dma.hbm_to_vmem [thread:$0]  %s679_s0, 256, %s606_s21, [#allocation3], %s572_s30, %s572_s30, %s573_s6  }
  0x23   :  { %s574_s18 = smov [#allocation7]   ;;  %s520_s23 = scalar_lea.hbm %s682_s3, 2048 }
  0x24   :  { %s44_s19 = sshll.u32 %s574_s18, 4  ;;  %p521_p2 = scmp.ne.s32.totalorder %s682_s3, %s520_s23  ;;  %s45_s19 = int_to_ptr.vmem [resolvable:$true] %s44_s19 }
  0x25   :  { %p524_p3 = scmp.lt.u32.totalorder %s520_s23, %s682_s3 }
  0x27   :  { %p526_p4 = pnand %p524_p3, %p521_p2 }
  0x29   :  { %529 = shalt.err (!%p526_p4)
}
  0x2a   :  { %s530_s28 = scalar_lea.vmem %s45_s19, 2048  ;;  %p535_p6 = scmp.lt.s32.totalorder %s45_s19, %s45_s19 }
  0x2b   :  { %p531_p5 = scmp.ne.s32.totalorder %s45_s19, %s530_s28  ;;  %p536_p7 = scmp.lt.s32.totalorder %s530_s28, %s530_s28 }
  0x2d   :  { %p537_p8 = por %p536_p7, %p535_p6 }
  0x2f   :  { %p538_p9 = pnand %p537_p8, %p531_p5 }
  0x31   :  { %541 = shalt.err (!%p538_p9)
}
  0x32   :  { %50 = dma.hbm_to_vmem [thread:$0]  %s682_s3, 2048, %s45_s19, [#allocation6], %s572_s30, %s572_s30, %s573_s6  }
  0x33   :  { %564 = dma.done.wait [#allocation3], 256  }
  0x34   :  { %565 = vsyncadd [#allocation3], 4294967040 }
  0x35   :  { %566 = dma.done.wait [#allocation6], 4096  }
  0x36   :  { %567 = vsyncadd [#allocation6], 4294963200  ;;  %v64_v0 = vld [vmem:[#allocation5] sm:$0xff]  ;;  %v65_v1 = vld [vmem:[#allocation5 + $0x8] sm:$0xff] }
  0x37   :  { %v66_v2 = vld [vmem:[#allocation5 + $0x10] sm:$0xff]  ;;  %v402_v3 = vpack.c.bf16 %v65_v1, %v64_v0  ;;  %v67_v4 = vld [vmem:[#allocation5 + $0x18] sm:$0xff]  ;;  %v68_v6 = vld [vmem:[#allocation5 + $0x20] sm:$0xff] }
  0x38   :  { %v406_v5 = vpack.c.bf16 %v67_v4, %v66_v2  ;;  %v69_v7 = vld [vmem:[#allocation5 + $0x28] sm:$0xff]  ;;  %v70_v9 = vld [vmem:[#allocation5 + $0x30] sm:$0xff]  ;;  %v71_v10 = vld [vmem:[#allocation5 + $0x38] sm:$0xff] }
  0x39   :  { %403 = vmatprep.subr.bf16.mxu0 %v402_v3  ;;  %v410_v8 = vpack.c.bf16 %v69_v7, %v68_v6  ;;  %v62_v11 = vld [vmem:[#allocation2] sm:$0xff]  ;;  %v164_v12 = vld [vmem:[#allocation7] sm:$0xff]  ;;  %v165_v13 = vld [vmem:[#allocation7 + $0x8] sm:$0xff]  ;;  %v414_v20 = vpack.c.bf16 %v71_v10, %v70_v9 }
  0x3a   :  { %405 = vmatpush3.bf16.msra.mxu0 %v402_v3  ;;  %364 = vmatprep.mubr.f32.mxu0 %v62_v11  ;;  %v166_v14 = vld [vmem:[#allocation7 + $0x10] sm:$0xff]  ;;  %v434_v15 = vpack.c.bf16 %v165_v13, %v164_v12  ;;  %v167_v16 = vld [vmem:[#allocation7 + $0x18] sm:$0xff]  ;;  %v168_v18 = vld [vmem:[#allocation7 + $0x20] sm:$0xff] }
  0x3b   :  { %407 = vmatprep.subr.bf16.mxu0 %v406_v5  ;;  %v438_v17 = vpack.c.bf16 %v167_v16, %v166_v14  ;;  %v169_v19 = vld [vmem:[#allocation7 + $0x28] sm:$0xff]  ;;  %v72_v21 = vld [vmem:[#allocation5 + $0x40] sm:$0xff]  ;;  %v170_v24 = vld [vmem:[#allocation7 + $0x30] sm:$0xff] }
  0x3c   :  { %435 = vmatprep.subr.bf16.mxu1 %v434_v15  ;;  %v73_v22 = vld [vmem:[#allocation5 + $0x48] sm:$0xff]  ;;  %v442_v23 = vpack.c.bf16 %v169_v19, %v168_v18  ;;  %v171_v25 = vld [vmem:[#allocation7 + $0x38] sm:$0xff]  ;;  %v74_v27 = vld [vmem:[#allocation5 + $0x50] sm:$0xff] }
  0x3d   :  { %437 = vmatpush3.bf16.msra.mxu1 %v434_v15  ;;  %v418_v26 = vpack.c.bf16 %v73_v22, %v72_v21  ;;  %v75_v28 = vld [vmem:[#allocation5 + $0x58] sm:$0xff]  ;;  %v446_v29 = vpack.c.bf16 %v171_v25, %v170_v24  ;;  %v172_v30 = vld [vmem:[#allocation7 + $0x40] sm:$0xff]  ;;  %v173_v31 = vld [vmem:[#allocation7 + $0x48] sm:$0xff] }
  0x3e   :  { %409 = vmatpush3.bf16.msra.mxu0 %v406_v5  ;;  %439 = vmatprep.subr.bf16.mxu1 %v438_v17  ;;  %v422_v32 = vpack.c.bf16 %v75_v28, %v74_v27  ;;  %v76_v33 = vld [vmem:[#allocation5 + $0x60] sm:$0xff]  ;;  %v77_v34 = vld [vmem:[#allocation5 + $0x68] sm:$0xff]  ;;  %v450_v35 = vpack.c.bf16 %v173_v31, %v172_v30  ;;  %v174_v36 = vld [vmem:[#allocation7 + $0x50] sm:$0xff] }
  0x3f   :  { %411 = vmatprep.subr.bf16.mxu0 %v410_v8  ;;  %v175_v37 = vld [vmem:[#allocation7 + $0x58] sm:$0xff]  ;;  %v426_v38 = vpack.c.bf16 %v77_v34, %v76_v33  ;;  %v78_v39 = vld [vmem:[#allocation5 + $0x70] sm:$0xff]  ;;  %v176_v42 = vld [vmem:[#allocation7 + $0x60] sm:$0xff] }
  0x40   :  { %v79_v40 = vld [vmem:[#allocation5 + $0x78] sm:$0xff]  ;;  %v454_v41 = vpack.c.bf16 %v175_v37, %v174_v36  ;;  %v177_v43 = vld [vmem:[#allocation7 + $0x68] sm:$0xff]  ;;  %v178_v47 = vld [vmem:[#allocation7 + $0x70] sm:$0xff] }
  0x41   :  { %441 = vmatpush3.bf16.msra.mxu1 %v438_v17  ;;  %v430_v44 = vpack.c.bf16 %v79_v40, %v78_v39  ;;  %v458_v45 = vpack.c.bf16 %v177_v43, %v176_v42  ;;  %v63_v46 = vld [vmem:[#allocation2 + $0x8] sm:$0xff]  ;;  %v294_v50 = vld [vmem:[%s681_s2] ss:$0 sm:$0xff]  ;;  %s575_s2 = smov [#allocation8]  }
  0x42   :  { %413 = vmatpush3.bf16.msra.mxu0 %v410_v8  ;;  %443 = vmatprep.subr.bf16.mxu1 %v442_v23  ;;  %v179_v48 = vld [vmem:[#allocation7 + $0x78] sm:$0xff]  ;;  %v295_v57 = vld [vmem:[%s683_s4] ss:$0 sm:$0xff]  ;;  %s281_s9 = sshll.u32 %s575_s2, 4  ;;  %s282_s9 = int_to_ptr.vmem [resolvable:$true] %s281_s9 }
  0x43   :  { %415 = vmatprep.subr.bf16.mxu0 %v414_v20  ;;  %v462_v49 = vpack.c.bf16 %v179_v48, %v178_v47  ;;  %s542_s4 = scalar_lea.vmem %s282_s9, 256  ;;  %p547_p11 = scmp.lt.s32.totalorder %s282_s9, %s282_s9 }
  0x44   :  { %p543_p10 = scmp.ne.s32.totalorder %s282_s9, %s542_s4  ;;  %p548_p12 = scmp.lt.s32.totalorder %s542_s4, %s542_s4 }
  0x45   :  { %445 = vmatpush3.bf16.msra.mxu1 %v442_v23 }
  0x46   :  { %417 = vmatpush3.bf16.msra.mxu0 %v414_v20  ;;  %447 = vmatprep.subr.bf16.mxu1 %v446_v29  ;;  %p549_p13 = por %p548_p12, %p547_p11 }
  0x47   :  { %419 = vmatprep.subr.bf16.mxu0 %v418_v26 }
  0x48   :  { %p550_p0 = pnand %p549_p13, %p543_p10 }
  0x49   :  { %449 = vmatpush3.bf16.msra.mxu1 %v446_v29 }
  0x4a   :  { %421 = vmatpush3.bf16.msra.mxu0 %v418_v26  ;;  %451 = vmatprep.subr.bf16.mxu1 %v450_v35 }
  0x4b   :  { %423 = vmatprep.subr.bf16.mxu0 %v422_v32 }
  0x4d   :  { %453 = vmatpush3.bf16.msra.mxu1 %v450_v35 }
  0x4e   :  { %425 = vmatpush3.bf16.msra.mxu0 %v422_v32  ;;  %455 = vmatprep.subr.bf16.mxu1 %v454_v41 }
  0x4f   :  { %427 = vmatprep.subr.bf16.mxu0 %v426_v38 }
  0x51   :  { %457 = vmatpush3.bf16.msra.mxu1 %v454_v41 }
  0x52   :  { %429 = vmatpush3.bf16.msra.mxu0 %v426_v38  ;;  %459 = vmatprep.subr.bf16.mxu1 %v458_v45 }
  0x53   :  { %431 = vmatprep.subr.bf16.mxu0 %v430_v44 }
  0x55   :  { %461 = vmatpush3.bf16.msra.mxu1 %v458_v45 }
  0x56   :  { %433 = vmatpush3.bf16.msra.mxu0 %v430_v44  ;;  %463 = vmatprep.subr.bf16.mxu1 %v462_v49 }
  0x59   :  { %365 = vmatmul.mubr.f32.vlgmr.msra.gmra.mrb[0].mxu0 %v63_v46  ;;  %465 = vmatpush3.bf16.msra.mxu1 %v462_v49 }
 0x12c   :  { %v366_v51 = vpop.f32.mrb[0].mxu0 }
 0x12d   :  { %v159_v52 = vadd.f32 %v366_v51, %v294_v50  ;;  %v153_v53 = vpop.f32.mrb[1].mxu0 }
 0x12e   :  { %v154_v54 = vadd.f32 %v294_v50, %v153_v53 }
 0x12f   :  { %v163_v56 = vmax.f32 %v159_v52, 0.0 }
 0x130   :  { %v162_v55 = vmax.f32 %v154_v54, 0.0 }
 0x132   :  { %399 = vmatprep.mubr.f32.mxu1 %v162_v55 }
 0x133   :  { %400 = vmatmul.mubr.f32.vlgmr.msra.gmra.mrb[0].mxu1 %v163_v56 }
 0x206   :  { %v401_v58 = vpop.f32.mrb[0].mxu1 }
 0x207   :  { %v253_v59 = vpop.f32.mrb[1].mxu1  ;;  %v259_v61 = vadd.f32 %v401_v58, %v295_v57 }
 0x208   :  { %v254_v60 = vadd.f32 %v295_v57, %v253_v59 }
 0x209   :  { %v263_v63 = vmul.f32 %v259_v61, %v259_v61 }
 0x20a   :  { %v262_v62 = vmul.f32 %v254_v60, %v254_v60 }
 0x20c   :  { %264 = vadd.xlane.f32.xlu0 %v262_v62 }
 0x210   :  { %266 = vadd.xlane.f32.xlu0 %v263_v63 }
 0x299   :  { %v265_v0 = vpop.xlane.xlu0 %264 }
 0x29a   :  { %v268_v1 = vmax.f32 %v265_v0, 1e-24 }
 0x29c   :  { %472 = vrsqrt.f32 %v268_v1 }
 0x29d   :  { %v267_v2 = vpop.xlane.xlu0 %266 }
 0x29e   :  { %v269_v3 = vmax.f32 %v267_v2, 1e-24 }
 0x2a0   :  { %474 = vrsqrt.f32 %v269_v3 }
 0x2a6   :  { %v473_v4 = vpop.eup %472 }
 0x2a7   :  { %v272_v5 = vmul.f32 %v473_v4, %v254_v60 }
 0x2a9   :  { %274 = vst [vmem:[#allocation8] sm:$0xff] %v272_v5 }
 0x2aa   :  { %v475_v6 = vpop.eup %474 }
 0x2ab   :  { %v273_v7 = vmul.f32 %v475_v6, %v259_v61 }
 0x2ad   :  { %275 = vst [vmem:[#allocation8 + $0x8] sm:$0xff] %v273_v7 }
 0x2ae   :  { %553 = shalt.err (!%p550_p0)
}
 0x2af   :  { %s554_s12 = scalar_lea.hbm %s684_s5, 256 }
 0x2b0   :  { %p555_p1 = scmp.ne.s32.totalorder %s684_s5, %s554_s12  ;;  %p558_p2 = scmp.lt.u32.totalorder %s554_s12, %s684_s5 }
 0x2b2   :  { %p560_p3 = pnand %p558_p2, %p555_p1 }
 0x2b4   :  { %563 = shalt.err (!%p560_p3)
}
 0x2b5   :  { %287 = dma.vmem_to_hbm [thread:$0]  %s282_s9, 256, %s684_s5, [#allocation4], %s572_s30, %s572_s30, %s573_s6  }
 0x2b6   :  { %568 = dma.done.wait [#allocation4], 256  }
 0x2b7   :  { %569 = vsyncadd [#allocation4], 4294967040 }
 0x2b8   :  { %291 = vsyncpa [#allocation3], 1 }
 0x2b9   :  { %292 = vsyncpa [#allocation6], 1 }
 0x2ba   :  { %293 = vsyncpa [#allocation4], 1 }

</bundles_post_ra>
